<compile_context>
chip_gen: v7x
topology: tpu7x:2x2x1
jax: 0.10.0
libtpu: 0.0.40
codegen_flags: <defaults>
</compile_context>

<pallas_src>
import jax
import jax.numpy as jnp
from jax.experimental import pallas as pl
from jax.experimental.pallas import tpu as pltpu


# ----------------------------------------------------------------------------
# Primary path: true identity (zero launches, zero HBM traffic)
# ----------------------------------------------------------------------------
def identity(x):
    """Identity forward pass: returns x unchanged (same buffer, no kernel)."""
    return x


# ----------------------------------------------------------------------------
# Materializing path: lane-dense tiled copy kernel
# ----------------------------------------------------------------------------
def _copy_kernel(x_ref, o_ref):
    o_ref[...] = x_ref[...]


def _target_tile_bytes():
    """Generation-aware tile size for the copy kernel.

    v5e (0.82 TB/s HBM): 2 MiB tiles already hide the ~0.35 us per-step
    overhead and keep double-buffered in+out (8 MiB) under the 16 MiB default
    scoped VMEM.  v6e / v7x: 4 MiB tiles (16 MiB double-buffered) sit well
    under the 32 MiB scoped default and under v7x's 64 MiB physical VMEM,
    while amortizing per-step overhead at 1.4-3.2 TB/s HBM.
    """
    try:
        kind = jax.devices()[0].device_kind.lower()
    except Exception:
        kind = ""
    if "v5" in kind:
        return 2 * 1024 * 1024
    return 4 * 1024 * 1024


def _tiled_copy_2d(slab):
    """Copy a (rows, cols) slab (cols a multiple of 128) near HBM roofline."""
    rows, cols = slab.shape
    itemsize = jnp.dtype(slab.dtype).itemsize

    sublane = max(8, 32 // itemsize)            # 8 f32 / 16 bf16 / 32 int8-fp8
    block_rows = max(sublane, _target_tile_bytes() // (cols * itemsize))
    block_rows = (block_rows // sublane) * sublane
    if rows <= block_rows:
        block_rows = rows                       # small slab: one full-extent tile
    grid = (pl.cdiv(rows, block_rows),)

    return pl.pallas_call(
        _copy_kernel,
        out_shape=jax.ShapeDtypeStruct((rows, cols), slab.dtype),
        grid=grid,
        in_specs=[pl.BlockSpec((block_rows, cols), lambda i: (i, 0))],
        out_specs=pl.BlockSpec((block_rows, cols), lambda i: (i, 0)),
        compiler_params=pltpu.CompilerParams(
            # Row grid shards across the 2 TensorCores on v7x megacore.
            dimension_semantics=("parallel",)),
        cost_estimate=pl.CostEstimate(
            flops=0, transcendentals=0,
            bytes_accessed=2 * rows * cols * itemsize),
    )(slab)


def identity_copy(x):
    """Materializing identity: copies x into a fresh buffer via Pallas.

    Common case (x.size % 128 == 0, true for most NN tensors): collapse to a
    lane-dense 2D slab (cols a large multiple of 128, up to 8192) and tile it
    directly -- no padding, no post-slice, so end-to-end HBM traffic is
    exactly read + write of the array.
    """
    orig_shape = x.shape
    total = x.size
    if total == 0:
        return x
    itemsize = jnp.dtype(x.dtype).itemsize

    # Pick the largest lane-dense column width (multiple of 128) dividing total.
    cols = None
    for c in (8192, 4096, 2048, 1024, 512, 384, 256, 128):
        if total % c == 0:
            cols = c
            break

    if cols is not None:
        slab = x.reshape(total // cols, cols)   # contiguous collapse: free
        return _tiled_copy_2d(slab).reshape(orig_shape)

    # Ragged total (x.size % 128 != 0): rare for NN tensors.
    flat = x.reshape(-1)
    if total * itemsize <= 4 * 1024 * 1024:
        # Small: single full-extent VMEM block, no padding, no post-slice.
        out = pl.pallas_call(
            _copy_kernel,
            out_shape=jax.ShapeDtypeStruct((total,), flat.dtype),
            cost_estimate=pl.CostEstimate(
                flops=0, transcendentals=0,
                bytes_accessed=2 * total * itemsize),
        )(flat)
        return out.reshape(orig_shape)

    # TODO(synk): large ragged totals still take a pad + slice path (extra HBM
    # traffic outside the kernel); only hit when x.size is large and not a
    # multiple of 128.
    cols = 1024
    padded_total = pl.cdiv(total, cols) * cols
    flat = jnp.pad(flat, (0, padded_total - total))
    out = _tiled_copy_2d(flat.reshape(padded_total // cols, cols))
    return out.reshape(-1)[:total].reshape(orig_shape)


if __name__ == "__main__":
    key = jax.random.PRNGKey(0)
    x = jax.random.normal(key, (2, 4, 16, 16), dtype=jnp.float32)  # NCHW

    # Primary (no-op) identity path.
    y = identity(x)
    jax.block_until_ready(y)
    assert y.shape == x.shape and y.dtype == x.dtype
    assert bool(jnp.all(y == x))

    # Materializing Pallas copy path (fresh buffer).
    y2 = identity_copy(x)
    jax.block_until_ready(y2)
    assert y2.shape == x.shape and y2.dtype == x.dtype
    assert bool(jnp.all(y2 == x))

    print("KERNEL_OK")
</pallas_src>

<mosaic_0001>
module attributes {stable_mosaic.version = 11 : i64} {
  func.func @_copy_kernel(%arg0: i32, %arg1: memref<1x2048xf32, #tpu.memory_space<vmem>>, %arg2: memref<1x2048xf32, #tpu.memory_space<vmem>>) attributes {dimension_semantics = [#tpu.dimension_semantics<parallel>], iteration_bounds = array<i64: 1>, scalar_prefetch = 0 : i64, scratch_operands = 0 : i64, tpu.core_type = #tpu.core_type<tc>, window_params = [{transform_indices = @transform_0, window_bounds = array<i64: 1, 2048>}, {transform_indices = @transform_1, window_bounds = array<i64: 1, 2048>}]} {
    %c0 = arith.constant 0 : index
    %c0_0 = arith.constant 0 : index
    %0 = vector.load %arg1[%c0, %c0_0] : memref<1x2048xf32, #tpu.memory_space<vmem>>, vector<1x2048xf32>
    %c0_1 = arith.constant 0 : index
    %c0_2 = arith.constant 0 : index
    %1 = vector.load %arg2[%c0_1, %c0_2] : memref<1x2048xf32, #tpu.memory_space<vmem>>, vector<1x2048xf32>
    tpu.vector_store %arg2[%c0_1, %c0_2], %0 {strides = array<i32>} : memref<1x2048xf32, #tpu.memory_space<vmem>>, vector<1x2048xf32>,
    return
  }
  func.func @transform_0(%arg0: i32) -> (i32, i32) {
    %c0_i32 = arith.constant 0 : i32
    %c0_i32_0 = arith.constant 0 : i32
    return %arg0, %c0_i32 : i32, i32
  }
  func.func @transform_1(%arg0: i32) -> (i32, i32) {
    %c0_i32 = arith.constant 0 : i32
    %c0_i32_0 = arith.constant 0 : i32
    return %arg0, %c0_i32 : i32, i32
  }
}

</mosaic_0001>

<bundles_post_ra>
// kernel: tpu_custom_call.1
= control target key start
LH: loop header
LB: loop body
LE: loop exit
PB: predicated region body
PF: predicated region fallthrough
CT: control target
= control target key end

     0   :  { %6 = vsyncpa [#allocation3], 0  ;;  %s126_s0 = inlined_call_operand.hbm [shape: f32[1,2048], index: 0, kind: input, shape index: {}]   ;;  %s127_s1 = inlined_call_operand.hbm [shape: f32[1,2048], index: 1, kind: output, shape index: {}]  }
   0x1   :  { %7 = vsyncpa [#allocation4], 0  ;;  %s90_s6 = smov [#allocation2]   ;;  %s42_s10 = scalar_lea.hbm %s126_s0, 256 }
   0x2   :  { %s14_s7 = sshll.u32 %s90_s6, 4  ;;  %p43_p0 = scmp.ne.s32.totalorder %s126_s0, %s42_s10  ;;  %s15_s7 = int_to_ptr.vmem [resolvable:$true] %s14_s7 }
   0x3   :  { %p46_p1 = scmp.lt.u32.totalorder %s42_s10, %s126_s0 }
   0x5   :  { %p48_p2 = pnand %p46_p1, %p43_p0 }
   0x7   :  { %51 = shalt.err (!%p48_p2)
}
   0x8   :  { %s52_s15 = scalar_lea.vmem %s15_s7, 256  ;;  %p57_p4 = scmp.lt.s32.totalorder %s15_s7, %s15_s7 }
   0x9   :  { %p53_p3 = scmp.ne.s32.totalorder %s15_s7, %s52_s15  ;;  %p58_p5 = scmp.lt.s32.totalorder %s52_s15, %s52_s15 }
   0xb   :  { %p59_p6 = por %p58_p5, %p57_p4 }
   0xd   :  { %p60_p7 = pnand %p59_p6, %p53_p3 }
   0xf   :  { %63 = shalt.err (!%p60_p7)
}
  0x10   :  { %17 = dma.hbm_to_vmem [thread:$0]  %s126_s0, 256, %s15_s7, [#allocation3]  }
  0x11   :  { %86 = dma.done.wait [#allocation3], 256  }
  0x12   :  { %87 = vsyncadd [#allocation3], 4294967040  ;;  %s91_s18 = smov [#allocation5]   ;;  %v21_v0 = vld [vmem:[#allocation2] sm:$0xff]  ;;  %v22_v1 = vld [vmem:[#allocation2 + $0x8] sm:$0xff] }
  0x13   :  { %s31_s19 = sshll.u32 %s91_s18, 4  ;;  %23 = vst [vmem:[#allocation5] sm:$0xff] %v21_v0  ;;  %24 = vst [vmem:[#allocation5 + $0x8] sm:$0xff] %v22_v1  ;;  %s32_s19 = int_to_ptr.vmem [resolvable:$true] %s31_s19 }
  0x14   :  { %s64_s20 = scalar_lea.vmem %s32_s19, 256  ;;  %p69_p9 = scmp.lt.s32.totalorder %s32_s19, %s32_s19 }
  0x15   :  { %p65_p8 = scmp.ne.s32.totalorder %s32_s19, %s64_s20  ;;  %p70_p10 = scmp.lt.s32.totalorder %s64_s20, %s64_s20 }
  0x17   :  { %p71_p11 = por %p70_p10, %p69_p9 }
  0x19   :  { %p72_p12 = pnand %p71_p11, %p65_p8 }
  0x1b   :  { %75 = shalt.err (!%p72_p12)
}
  0x1c   :  { %s76_s0 = scalar_lea.hbm %s127_s1, 256 }
  0x1d   :  { %p77_p13 = scmp.ne.s32.totalorder %s127_s1, %s76_s0  ;;  %p80_p0 = scmp.lt.u32.totalorder %s76_s0, %s127_s1 }
  0x1f   :  { %p82_p1 = pnand %p80_p0, %p77_p13 }
  0x21   :  { %85 = shalt.err (!%p82_p1)
}
  0x22   :  { %34 = dma.vmem_to_hbm [thread:$0]  %s32_s19, 256, %s127_s1, [#allocation4]  }
  0x23   :  { %88 = dma.done.wait [#allocation4], 256  }
  0x24   :  { %89 = vsyncadd [#allocation4], 4294967040 }
  0x25   :  { %38 = vsyncpa [#allocation3], 1 }
  0x26   :  { %39 = vsyncpa [#allocation4], 1 }

</bundles_post_ra>
